<compile_context>
chip_gen: v5e
topology: v5e:2x2
jax: 0.10.0
libtpu: 0.0.40
codegen_flags: <defaults>
</compile_context>

<pallas_src>
import functools

import jax
import jax.numpy as jnp
from jax import lax
from jax.experimental import pallas as pl
from jax.experimental.pallas import tpu as pltpu


# ---------------------------------------------------------------------------
# Kernels
# ---------------------------------------------------------------------------

def _deconv_stats_kernel(x_ref, w_ref, sum_ref, sq_ref):
    """Fused-deconv matmul + per-tile BatchNorm partial sums.

    x_ref:   (1, 4Cin, TP)  shifted-tap slab, channel-major, bf16/f32
    w_ref:   (4Cout, 4Cin)  combined deconv weight (rows = (c, pi, pj))
    sum_ref: (1, 1, 4Cout, 1) per-(batch, tile) sum over pixels, f32
    sq_ref:  (1, 1, 4Cout, 1) per-(batch, tile) sum of squares, f32
    """
    yt = jnp.dot(w_ref[...], x_ref[0], preferred_element_type=jnp.float32)
    sum_ref[0, 0] = jnp.sum(yt, axis=1, keepdims=True)
    sq_ref[0, 0] = jnp.sum(yt * yt, axis=1, keepdims=True)


def _deconv_bn_relu_kernel(x_ref, w_ref, scale_ref, shift_ref, o_ref):
    """Recompute the fused-deconv matmul, apply BN affine + ReLU, store planes.

    x_ref:     (1, 4Cin, TP)   bf16/f32
    w_ref:     (4Cout, 4Cin)   bf16/f32
    scale_ref: (4Cout, 1)      f32 (gamma * rsqrt(var+eps), per parity-channel row)
    shift_ref: (4Cout, 1)      f32 (beta - mean*scale)
    o_ref:     (1, 4Cout, TP)  compute dtype (bf16 on the fast path)
    """
    yt = jnp.dot(w_ref[...], x_ref[0], preferred_element_type=jnp.float32)
    o_ref[0] = jnp.maximum(yt * scale_ref[...] + shift_ref[...], 0.0).astype(o_ref.dtype)


# ---------------------------------------------------------------------------
# Static tiling helpers
# ---------------------------------------------------------------------------

def _divisors(n):
    out = set()
    i = 1
    while i * i <= n:
        if n % i == 0:
            out.add(i)
            out.add(n // i)
        i += 1
    return sorted(out)


def _pick_pixel_tile(hw, max_tp):
    """Pixel tile TP, grid extent G and padded pixel count HWp = TP * G.

    Prefers the largest 128-lane-aligned divisor of hw that fits the VMEM
    budget; otherwise takes the whole (small) problem, or pads the pixel axis
    up to a lane-aligned tile (never returns an oversized tile -> v7x safe).
    """
    max_tp = min(max(128, max_tp), max(hw, 128))
    aligned = [d for d in _divisors(hw) if d % 128 == 0 and d <= max_tp]
    if aligned:
        tp = max(aligned)
        return tp, hw // tp, hw
    if hw <= max_tp:                       # small problem: one full-width tile
        return hw, 1, hw
    tp = max_tp - (max_tp % 128)           # pad the pixel axis to a clean tile
    g = -(-hw // tp)
    return tp, g, tp * g


def _vmem_limit_bytes():
    """Scoped VMEM limit derived from the device (v5e/v6e: ~64MiB, v7x: ~32MiB)."""
    cap = 64 * 1024 * 1024
    try:
        cap = int(getattr(pltpu.get_tpu_info(), "vmem_capacity_bytes", cap))
    except Exception:
        pass
    return max(16 * 1024 * 1024, min(cap // 2, 96 * 1024 * 1024))


# ---------------------------------------------------------------------------
# Weight folding
# ---------------------------------------------------------------------------

def _combined_weight(weight, cin, cout, dtype):
    """All 9 deconv taps folded into one (4Cout, 4Cin) matrix.

    Columns (4Cin) follow the slab tap order [x(i,j), x(i,j+1), x(i+1,j),
    x(i+1,j+1)]; rows (4Cout) are ordered (c, pi, pj) so the 4 output-parity
    planes of each channel are adjacent (cheap final de-interleave).
    """
    wt = jnp.transpose(weight, (2, 3, 0, 1)).astype(jnp.float32)   # (3,3,Cin,Cout)
    z = jnp.zeros((cin, cout), jnp.float32)
    p00 = jnp.concatenate([wt[1, 1], z,        z,        z       ], axis=0)
    p01 = jnp.concatenate([wt[1, 2], wt[1, 0], z,        z       ], axis=0)
    p10 = jnp.concatenate([wt[2, 1], z,        wt[0, 1], z       ], axis=0)
    p11 = jnp.concatenate([wt[2, 2], wt[2, 0], wt[0, 2], wt[0, 0]], axis=0)
    q = jnp.stack([p00, p01, p10, p11], axis=0)                    # (4, 4Cin, Cout)
    wc = jnp.transpose(q, (2, 0, 1)).reshape(4 * cout, 4 * cin)    # rows = (c,pi,pj)
    return wc.astype(dtype)


# ---------------------------------------------------------------------------
# Wrapper
# ---------------------------------------------------------------------------

def upsampler_b_forward(x_nchw, weight, bias, gamma, beta, eps=1e-3,
                        compute_dtype=jnp.bfloat16):
    """upsamplerB forward. x_nchw: (N, Cin, H, W) f32 -> (N, Cout, 2H, 2W) f32."""
    # The deconv bias cancels exactly under training-mode BatchNorm.
    del bias

    N, Cin, H, W = x_nchw.shape
    Cout = weight.shape[1]
    Ho, Wo = 2 * H, 2 * W
    HW = H * W
    K = 4 * Cin            # matmul contraction width (shifted-tap slab)
    M = 4 * Cout           # parity-expanded output features

    # ---- shifted-tap slab, channel-major: built from NCHW with NO transpose --
    x = x_nchw.astype(jnp.float32)
    xp = jnp.pad(x, ((0, 0), (0, 0), (0, 1), (0, 1)))              # +1 row/col of zeros
    xs = jnp.concatenate(
        [xp[:, :, :H, :W], xp[:, :, :H, 1:], xp[:, :, 1:, :W], xp[:, :, 1:, 1:]],
        axis=1).reshape(N, K, HW).astype(compute_dtype)            # (N, 4Cin, H*W)

    # ---- VMEM-aware pixel tiling --------------------------------------------
    itemsize = jnp.dtype(compute_dtype).itemsize
    vmem_limit = _vmem_limit_bytes()
    bytes_per_pixel = 2 * (K + M) * itemsize          # x + out blocks, double-buffered
    max_tp = max(128, int(0.5 * vmem_limit) // max(bytes_per_pixel, 1))
    TP, G, HWp = _pick_pixel_tile(HW, max_tp)
    if HWp != HW:
        # Padded pixels are all-zero -> their conv output is exactly 0 (no bias),
        # so they contribute nothing to the BN sums; they are sliced off below.
        xs = jnp.pad(xs, ((0, 0), (0, 0), (0, HWp - HW)))

    w_c = _combined_weight(weight, Cin, Cout, compute_dtype)       # (4Cout, 4Cin)

    cparams = pltpu.CompilerParams(
        dimension_semantics=("parallel", "parallel"),
        vmem_limit_bytes=vmem_limit)

    # ---- pass 1: fused matmul + per-(batch, tile) partial BN stats ----------
    sums, sqs = pl.pallas_call(
        _deconv_stats_kernel,
        grid=(N, G),
        in_specs=[
            pl.BlockSpec((1, K, TP), lambda n, g: (n, 0, g)),
            pl.BlockSpec((M, K), lambda n, g: (0, 0)),
        ],
        out_specs=(
            pl.BlockSpec((1, 1, M, 1), lambda n, g: (n, g, 0, 0)),
            pl.BlockSpec((1, 1, M, 1), lambda n, g: (n, g, 0, 0)),
        ),
        out_shape=(
            jax.ShapeDtypeStruct((N, G, M, 1), jnp.float32),
            jax.ShapeDtypeStruct((N, G, M, 1), jnp.float32),
        ),
        compiler_params=cparams,
    )(xs, w_c)

    # ---- BatchNorm statistics (training mode, biased variance) --------------
    count = jnp.float32(N * Ho * Wo)
    s_c = sums.sum(axis=(0, 1)).reshape(Cout, 4).sum(axis=1)       # per-channel sum
    q_c = sqs.sum(axis=(0, 1)).reshape(Cout, 4).sum(axis=1)        # per-channel sumsq
    mean = s_c / count
    var = jnp.maximum(q_c / count - mean * mean, 0.0)
    scale = gamma.astype(jnp.float32) * lax.rsqrt(var + eps)
    shift = beta.astype(jnp.float32) - mean * scale
    scale_r = jnp.repeat(scale, 4).reshape(M, 1)                   # per (c, pi, pj) row
    shift_r = jnp.repeat(shift, 4).reshape(M, 1)

    # ---- pass 2: recompute matmul, fused BN + ReLU, lane-dense narrow store --
    # (Recompute beats stashing y while Cin < 2*Cout; flip to a stash-y scheme
    #  for channel-reducing decoders where Cin > 2*Cout.)
    planes = pl.pallas_call(
        _deconv_bn_relu_kernel,
        grid=(N, G),
        in_specs=[
            pl.BlockSpec((1, K, TP), lambda n, g: (n, 0, g)),
            pl.BlockSpec((M, K), lambda n, g: (0, 0)),
            pl.BlockSpec((M, 1), lambda n, g: (0, 0)),
            pl.BlockSpec((M, 1), lambda n, g: (0, 0)),
        ],
        out_specs=pl.BlockSpec((1, M, TP), lambda n, g: (n, 0, g)),
        out_shape=jax.ShapeDtypeStruct((N, M, HWp), compute_dtype),
        compiler_params=cparams,
    )(xs, w_c, scale_r, shift_r)

    # ---- single XLA pass: parity de-interleave + cast into the required NCHW --
    z = planes[:, :, :HW].reshape(N, Cout, 2, 2, H, W)             # [n, c, pi, pj, i, j]
    out = jnp.transpose(z, (0, 1, 4, 2, 5, 3)).reshape(N, Cout, Ho, Wo)
    return out.astype(jnp.float32)


# ---------------------------------------------------------------------------
# Independent pure-JAX reference
# ---------------------------------------------------------------------------

def reference_forward(x_nchw, weight, bias, gamma, beta, eps=1e-3):
    """Pure-JAX reference via dilated convolution (independent code path)."""
    w_t = jnp.transpose(weight, (1, 0, 2, 3))[:, :, ::-1, ::-1]
    y = lax.conv_general_dilated(
        x_nchw, w_t, window_strides=(1, 1), padding=[(1, 2), (1, 2)],
        lhs_dilation=(2, 2), rhs_dilation=(1, 1),
        dimension_numbers=("NCHW", "OIHW", "NCHW"))
    y = y + bias[None, :, None, None]
    mean = y.mean(axis=(0, 2, 3))
    var = y.var(axis=(0, 2, 3))          # biased, as PyTorch BN normalization uses
    y = (y - mean[None, :, None, None]) * lax.rsqrt(var + eps)[None, :, None, None]
    y = y * gamma[None, :, None, None] + beta[None, :, None, None]
    return jnp.maximum(y, 0.0)


if __name__ == "__main__":
    key = jax.random.PRNGKey(0)
    k1, k2, k3, k4, k5 = jax.random.split(key, 5)

    N, Cin, Cout, H, W = 2, 4, 8, 16, 16
    x = jax.random.normal(k1, (N, Cin, H, W), jnp.float32)
    weight = 0.2 * jax.random.normal(k2, (Cin, Cout, 3, 3), jnp.float32)
    bias = 0.1 * jax.random.normal(k3, (Cout,), jnp.float32)
    gamma = 1.0 + 0.1 * jax.random.normal(k4, (Cout,), jnp.float32)
    beta = 0.1 * jax.random.normal(k5, (Cout,), jnp.float32)

    ref = reference_forward(x, weight, bias, gamma, beta)

    # f32 MXU operands: numerically tight path.
    fwd_f32 = jax.jit(functools.partial(upsampler_b_forward,
                                        compute_dtype=jnp.float32))
    out_f32 = jax.block_until_ready(fwd_f32(x, weight, bias, gamma, beta))
    assert out_f32.shape == (N, Cout, 2 * H, 2 * W), out_f32.shape
    err32 = float(jnp.max(jnp.abs(out_f32 - ref)))
    assert jnp.allclose(out_f32, ref, atol=2e-4, rtol=2e-4), err32

    # bf16 MXU operands + bf16 planes store with f32 accumulation: fast path.
    fwd_bf16 = jax.jit(functools.partial(upsampler_b_forward,
                                         compute_dtype=jnp.bfloat16))
    out_bf16 = jax.block_until_ready(fwd_bf16(x, weight, bias, gamma, beta))
    assert out_bf16.shape == (N, Cout, 2 * H, 2 * W), out_bf16.shape
    err16 = float(jnp.max(jnp.abs(out_bf16 - ref)))
    assert jnp.allclose(out_bf16, ref, atol=6e-2, rtol=6e-2), err16

    print("KERNEL_OK")
</pallas_src>

<mosaic_0001>
module attributes {stable_mosaic.version = 11 : i64} {
  func.func @_deconv_stats_kernel(%arg0: i32, %arg1: i32, %arg2: memref<1x16x256xf32, #tpu.memory_space<vmem>>, %arg3: memref<32x16xf32, #tpu.memory_space<vmem>>, %arg4: memref<1x1x32x1xf32, #tpu.memory_space<vmem>>, %arg5: memref<1x1x32x1xf32, #tpu.memory_space<vmem>>) attributes {dimension_semantics = [#tpu.dimension_semantics<parallel>, #tpu.dimension_semantics<parallel>], iteration_bounds = array<i64: 2, 1>, scalar_prefetch = 0 : i64, scratch_operands = 0 : i64, tpu.core_type = #tpu.core_type<tc>, window_params = [{transform_indices = @transform_0, window_bounds = array<i64: 1, 16, 256>}, {pipeline_mode = #tpu.pipeline_mode<synchronous>, transform_indices = @transform_1, window_bounds = array<i64: 32, 16>}, {transform_indices = @transform_2, window_bounds = array<i64: 1, 1, 32, 1>}, {transform_indices = @transform_3, window_bounds = array<i64: 1, 1, 32, 1>}]} {
    %c0 = arith.constant 0 : index
    %c0_0 = arith.constant 0 : index
    %0 = vector.load %arg3[%c0, %c0_0] : memref<32x16xf32, #tpu.memory_space<vmem>>, vector<32x16xf32>
    %c0_1 = arith.constant 0 : index
    %c0_2 = arith.constant 0 : index
    %c0_3 = arith.constant 0 : index
    %1 = vector.load %arg2[%c0_1, %c0_2, %c0_3] : memref<1x16x256xf32, #tpu.memory_space<vmem>>, vector<1x16x256xf32>
    %2 = vector.shape_cast %1 : vector<1x16x256xf32> to vector<16x256xf32>
    %cst = arith.constant dense<0.000000e+00> : vector<32x256xf32>
    %3 = tpu.matmul %0, %2, %cst {dimension_numbers = #tpu.dot_dimension_numbers<[1], [0], [0], [1], [0, 0, 1, 1], [], []>} : vector<32x16xf32>, vector<16x256xf32>, vector<32x256xf32> -> vector<32x256xf32>
    %cst_4 = arith.constant dense<0.000000e+00> : vector<32xf32>
    %4 = vector.multi_reduction <add>, %3, %cst_4 [1] : vector<32x256xf32> to vector<32xf32>
    %5 = vector.shape_cast %4 : vector<32xf32> to vector<32x1xf32>
    %c0_5 = arith.constant 0 : index
    %c0_6 = arith.constant 0 : index
    %c0_7 = arith.constant 0 : index
    %c0_8 = arith.constant 0 : index
    %6 = vector.load %arg4[%c0_5, %c0_6, %c0_7, %c0_8] : memref<1x1x32x1xf32, #tpu.memory_space<vmem>>, vector<1x1x32x1xf32>
    %7 = vector.shape_cast %6 : vector<1x1x32x1xf32> to vector<32x1xf32>
    %8 = vector.shape_cast %5 : vector<32x1xf32> to vector<1x1x32x1xf32>
    tpu.vector_store %arg4[%c0_5, %c0_6, %c0_7, %c0_8], %8 {strides = array<i32>} : memref<1x1x32x1xf32, #tpu.memory_space<vmem>>, vector<1x1x32x1xf32>,
    %9 = arith.mulf %3, %3 : vector<32x256xf32>
    %cst_9 = arith.constant dense<0.000000e+00> : vector<32xf32>
    %10 = vector.multi_reduction <add>, %9, %cst_9 [1] : vector<32x256xf32> to vector<32xf32>
    %11 = vector.shape_cast %10 : vector<32xf32> to vector<32x1xf32>
    %c0_10 = arith.constant 0 : index
    %c0_11 = arith.constant 0 : index
    %c0_12 = arith.constant 0 : index
    %c0_13 = arith.constant 0 : index
    %12 = vector.load %arg5[%c0_10, %c0_11, %c0_12, %c0_13] : memref<1x1x32x1xf32, #tpu.memory_space<vmem>>, vector<1x1x32x1xf32>
    %13 = vector.shape_cast %12 : vector<1x1x32x1xf32> to vector<32x1xf32>
    %14 = vector.shape_cast %11 : vector<32x1xf32> to vector<1x1x32x1xf32>
    tpu.vector_store %arg5[%c0_10, %c0_11, %c0_12, %c0_13], %14 {strides = array<i32>} : memref<1x1x32x1xf32, #tpu.memory_space<vmem>>, vector<1x1x32x1xf32>,
    return
  }
  func.func @transform_0(%arg0: i32, %arg1: i32) -> (i32, i32, i32) {
    %c0_i32 = arith.constant 0 : i32
    %c0_i32_0 = arith.constant 0 : i32
    return %arg0, %c0_i32, %arg1 : i32, i32, i32
  }
  func.func @transform_1(%arg0: i32, %arg1: i32) -> (i32, i32) {
    %c0_i32 = arith.constant 0 : i32
    %c0_i32_0 = arith.constant 0 : i32
    %c0_i32_1 = arith.constant 0 : i32
    return %c0_i32, %c0_i32_0 : i32, i32
  }
  func.func @transform_2(%arg0: i32, %arg1: i32) -> (i32, i32, i32, i32) {
    %c0_i32 = arith.constant 0 : i32
    %c0_i32_0 = arith.constant 0 : i32
    %c0_i32_1 = arith.constant 0 : i32
    return %arg0, %arg1, %c0_i32, %c0_i32_0 : i32, i32, i32, i32
  }
  func.func @transform_3(%arg0: i32, %arg1: i32) -> (i32, i32, i32, i32) {
    %c0_i32 = arith.constant 0 : i32
    %c0_i32_0 = arith.constant 0 : i32
    %c0_i32_1 = arith.constant 0 : i32
    return %arg0, %arg1, %c0_i32, %c0_i32_0 : i32, i32, i32, i32
  }
}

module attributes {stable_mosaic.version = 11 : i64} {
  func.func @_deconv_bn_relu_kernel(%arg0: i32, %arg1: i32, %arg2: memref<1x16x256xf32, #tpu.memory_space<vmem>>, %arg3: memref<32x16xf32, #tpu.memory_space<vmem>>, %arg4: memref<32x1xf32, #tpu.memory_space<vmem>>, %arg5: memref<32x1xf32, #tpu.memory_space<vmem>>, %arg6: memref<1x32x256xf32, #tpu.memory_space<vmem>>) attributes {dimension_semantics = [#tpu.dimension_semantics<parallel>, #tpu.dimension_semantics<parallel>], iteration_bounds = array<i64: 2, 1>, scalar_prefetch = 0 : i64, scratch_operands = 0 : i64, tpu.core_type = #tpu.core_type<tc>, window_params = [{transform_indices = @transform_0, window_bounds = array<i64: 1, 16, 256>}, {pipeline_mode = #tpu.pipeline_mode<synchronous>, transform_indices = @transform_1, window_bounds = array<i64: 32, 16>}, {pipeline_mode = #tpu.pipeline_mode<synchronous>, transform_indices = @transform_2, window_bounds = array<i64: 32, 1>}, {pipeline_mode = #tpu.pipeline_mode<synchronous>, transform_indices = @transform_3, window_bounds = array<i64: 32, 1>}, {transform_indices = @transform_4, window_bounds = array<i64: 1, 32, 256>}]} {
    %c0 = arith.constant 0 : index
    %c0_0 = arith.constant 0 : index
    %0 = vector.load %arg3[%c0, %c0_0] : memref<32x16xf32, #tpu.memory_space<vmem>>, vector<32x16xf32>
    %c0_1 = arith.constant 0 : index
    %c0_2 = arith.constant 0 : index
    %c0_3 = arith.constant 0 : index
    %1 = vector.load %arg2[%c0_1, %c0_2, %c0_3] : memref<1x16x256xf32, #tpu.memory_space<vmem>>, vector<1x16x256xf32>
    %2 = vector.shape_cast %1 : vector<1x16x256xf32> to vector<16x256xf32>
    %cst = arith.constant dense<0.000000e+00> : vector<32x256xf32>
    %3 = tpu.matmul %0, %2, %cst {dimension_numbers = #tpu.dot_dimension_numbers<[1], [0], [0], [1], [0, 0, 1, 1], [], []>} : vector<32x16xf32>, vector<16x256xf32>, vector<32x256xf32> -> vector<32x256xf32>
    %c0_4 = arith.constant 0 : index
    %c0_5 = arith.constant 0 : index
    %4 = vector.load %arg4[%c0_4, %c0_5] : memref<32x1xf32, #tpu.memory_space<vmem>>, vector<32x1xf32>
    %5 = vector.broadcast %4 : vector<32x1xf32> to vector<32x256xf32>
    %6 = arith.mulf %3, %5 : vector<32x256xf32>
    %c0_6 = arith.constant 0 : index
    %c0_7 = arith.constant 0 : index
    %7 = vector.load %arg5[%c0_6, %c0_7] : memref<32x1xf32, #tpu.memory_space<vmem>>, vector<32x1xf32>
    %8 = vector.broadcast %7 : vector<32x1xf32> to vector<32x256xf32>
    %9 = arith.addf %6, %8 : vector<32x256xf32>
    %cst_8 = arith.constant 0.000000e+00 : f32
    %10 = vector.broadcast %cst_8 : f32 to vector<32x256xf32>
    %11 = arith.maximumf %9, %10 : vector<32x256xf32>
    %c0_9 = arith.constant 0 : index
    %c0_10 = arith.constant 0 : index
    %c0_11 = arith.constant 0 : index
    %12 = vector.load %arg6[%c0_9, %c0_10, %c0_11] : memref<1x32x256xf32, #tpu.memory_space<vmem>>, vector<1x32x256xf32>
    %13 = vector.shape_cast %12 : vector<1x32x256xf32> to vector<32x256xf32>
    %14 = vector.shape_cast %11 : vector<32x256xf32> to vector<1x32x256xf32>
    tpu.vector_store %arg6[%c0_9, %c0_10, %c0_11], %14 {strides = array<i32>} : memref<1x32x256xf32, #tpu.memory_space<vmem>>, vector<1x32x256xf32>,
    return
  }
  func.func @transform_0(%arg0: i32, %arg1: i32) -> (i32, i32, i32) {
    %c0_i32 = arith.constant 0 : i32
    %c0_i32_0 = arith.constant 0 : i32
    return %arg0, %c0_i32, %arg1 : i32, i32, i32
  }
  func.func @transform_1(%arg0: i32, %arg1: i32) -> (i32, i32) {
    %c0_i32 = arith.constant 0 : i32
    %c0_i32_0 = arith.constant 0 : i32
    %c0_i32_1 = arith.constant 0 : i32
    return %c0_i32, %c0_i32_0 : i32, i32
  }
  func.func @transform_2(%arg0: i32, %arg1: i32) -> (i32, i32) {
    %c0_i32 = arith.constant 0 : i32
    %c0_i32_0 = arith.constant 0 : i32
    %c0_i32_1 = arith.constant 0 : i32
    return %c0_i32, %c0_i32_0 : i32, i32
  }
  func.func @transform_3(%arg0: i32, %arg1: i32) -> (i32, i32) {
    %c0_i32 = arith.constant 0 : i32
    %c0_i32_0 = arith.constant 0 : i32
    %c0_i32_1 = arith.constant 0 : i32
    return %c0_i32, %c0_i32_0 : i32, i32
  }
  func.func @transform_4(%arg0: i32, %arg1: i32) -> (i32, i32, i32) {
    %c0_i32 = arith.constant 0 : i32
    %c0_i32_0 = arith.constant 0 : i32
    return %arg0, %c0_i32, %arg1 : i32, i32, i32
  }
}

</mosaic_0001>

<bundles_post_ra>
// kernel: upsampler_b_forward.2
= control target key start
LH: loop header
LB: loop body
LE: loop exit
PB: predicated region body
PF: predicated region fallthrough
CT: control target
= control target key end

     0   :  { %s590_s12 = smov 0   ;;  %s592_s13 = smov 0   ;;  %s651_s0 = inlined_call_operand.vmem [shape: f32[2,16,256], index: 0, kind: input, shape index: {}]   ;;  %s652_s1 = inlined_call_operand.vmem [shape: f32[32,16], index: 1, kind: input, shape index: {}]   ;;  %s653_s2 = inlined_call_operand.vmem [shape: f32[2,1,32,1], index: 2, kind: output, shape index: {0}]   ;;  %s654_s3 = inlined_call_operand.vmem [shape: f32[2,1,32,1], index: 3, kind: output, shape index: {1}]  }
   0x1   :  { %s594_s14 = smov 0  }
   0x2 LB: > { %s26_s15 = sadd.s32 1, %s564_s13  ;;  %p498_p0 = scmp.ge.s32.totalorder %s568_s14, 1  ;;  %s568_s14 = sphi %s594_s14, %s14_s14   ;;  %s564_s13 = sphi %s592_s13, %s656_s13   ;;  %s560_s12 = sphi %s590_s12, %s655_s12  }
   0x3   : > { %p28_p1 = scmp.ge.s32.totalorder %s26_s15, 2  ;;  %p163_p2 = scmp.lt.s32.totalorder %s568_s14, 3 }
   0x5   : > { %s658_s15 = smov (%p28_p1, %s26_s15), 0  ;;  %p164_p3 = pnand %p498_p0, %p163_p2 }
   0x6   : > { %p205_p4 = scmp.lt.s32.totalorder (!%p164_p3), %s560_s12, 1 }
   0x7   : > { %167 = sbr.rel (%p164_p3) target bundleno = 288 (0x120), region = 28 }
   0xc   : > { %s660_s12 = smov (!%p205_p4, %s560_s12), 1  ;;  %v232_v4 = vld [vmem:[%s652_s1] sm:$0xff]  ;;  %vm240_vm0 = vcmask 130048   ;;  %v234_v5 = vld [vmem:[%s652_s1 + $0x10] sm:$0xff]  ;;  %v233_v6 = vld [vmem:[%s652_s1 + $0x8] sm:$0xff]  ;;  %vm323_vm1 = vcmask 7168  }
   0xd   : > { %s608_s16 = sshll.u32 %s660_s12, 5  ;;  %v235_v7 = vld [vmem:[%s652_s1 + $0x18] sm:$0xff] }
   0xe   : > { %s212_s19 = scalar_lea.vmem %s651_s0, %s608_s16  ;;  %s222_s30 = scalar_lea.vmem %s653_s2, %s608_s16 }
   0xf   : > { %v238_v0 = vld [vmem:[%s212_s19 + $0x10] sm:$0xff]  ;;  %v239_v1 = vld [vmem:[%s212_s19 + $0x18] sm:$0xff]  ;;  %v236_v2 = vld [vmem:[%s212_s19] sm:$0xff]  ;;  %s231_s6 = scalar_lea.vmem %s654_s3, %s608_s16 }
  0x10   : > { %267 = vmatpush.msra.mxu0 %v238_v0  ;;  %518 = vmatpush.msra.mxu2 %v238_v0  ;;  %v237_v3 = vld [vmem:[%s212_s19 + $0x8] sm:$0xff] }
  0x11   : > { %296 = vmatpush.msra.mxu1 %v239_v1  ;;  %520 = vmatpush.msra.mxu3 %v239_v1 }
  0x12   : > { %268 = vmatpush.msra.mxu0 %v236_v2  ;;  %519 = vmatpush.msra.mxu2 %v236_v2 }
  0x13   : > { %297 = vmatpush.msra.mxu1 %v237_v3  ;;  %521 = vmatpush.msra.mxu3 %v237_v3 }
  0x14   : > { %505 = vmatmul.msk.f32.vlgmr.msra.gmra.mxu0 %vm240_vm0, %v232_v4  ;;  %507 = vmatmul.msk.f32.vlgmr.msra.gmra.mxu2 %vm240_vm0, %v234_v5 }
  0x15   : > { %509 = vmatmul.msk.f32.vlgmr.msra.gmra.mxu1 %vm240_vm0, %v232_v4  ;;  %511 = vmatmul.msk.f32.vlgmr.msra.gmra.mxu3 %vm240_vm0, %v234_v5 }
  0x1c   : > { %506 = vmatmul.msk.f32.gmra.mxu0 %vm240_vm0, %v233_v6  ;;  %508 = vmatmul.msk.f32.gmra.mxu2 %vm240_vm0, %v235_v7 }
  0x1d   : > { %510 = vmatmul.msk.f32.gmra.mxu1 %vm240_vm0, %v233_v6  ;;  %512 = vmatmul.msk.f32.gmra.mxu3 %vm240_vm0, %v235_v7 }
  0x91   : > { %v270_v8 = vpop.f32.mrf.mxu0 }
  0x92   : > { %v328_v9 = vmul.f32 %v270_v8, %v270_v8  ;;  %v299_v10 = vpop.f32.mrf.mxu1 }
  0x93   : > { %v329_v11 = vmul.f32 %v299_v10, %v299_v10  ;;  %v311_v12 = vadd.f32 %v299_v10, %v270_v8 }
  0x95   : > { %312 = vadd.xlane.f32.xlu0 %v311_v12  ;;  %v336_v13 = vadd.f32 %v329_v11, %v328_v9 }
  0x97   : > { %v276_v14 = vpop.f32.mrf.mxu2  ;;  %337 = vadd.xlane.f32.xlu2 %v336_v13 }
  0x98   : > { %v305_v15 = vpop.f32.mrf.mxu3  ;;  %v332_v23 = vmul.f32 %v276_v14, %v276_v14 }
  0x99   : > { %v273_v16 = vpop.f32.mrf.mxu0  ;;  %v317_v17 = vadd.f32 %v305_v15, %v276_v14  ;;  %v333_v24 = vmul.f32 %v305_v15, %v305_v15 }
  0x9a   : > { %v330_v18 = vmul.f32 %v273_v16, %v273_v16  ;;  %v302_v19 = vpop.f32.mrf.mxu1 }
  0x9b   : > { %v314_v20 = vadd.f32 %v302_v19, %v273_v16  ;;  %v331_v21 = vmul.f32 %v302_v19, %v302_v19  ;;  %318 = vadd.xlane.f32.xlu1 %v317_v17  ;;  %v342_v28 = vadd.f32 %v333_v24, %v332_v23 }
  0x9d   : > { %315 = vadd.xlane.f32.xlu0 %v314_v20  ;;  %v339_v22 = vadd.f32 %v331_v21, %v330_v18 }
  0x9f   : > { %v279_v25 = vpop.f32.mrf.mxu2  ;;  %340 = vadd.xlane.f32.xlu2 %v339_v22 }
  0xa0   : > { %v308_v26 = vpop.f32.mrf.mxu3  ;;  %v334_v29 = vmul.f32 %v279_v25, %v279_v25 }
  0xa1   : > { %v320_v27 = vadd.f32 %v308_v26, %v279_v25  ;;  %v335_v30 = vmul.f32 %v308_v26, %v308_v26 }
  0xa3   : > { %321 = vadd.xlane.f32.xlu1 %v320_v27  ;;  %v345_v31 = vadd.f32 %v335_v30, %v334_v29 }
  0xa5   : > { %343 = vadd.xlane.f32.xlu0 %v342_v28 }
  0xab   : > { %346 = vadd.xlane.f32.xlu1 %v345_v31 }
 0x108   : > { %v313_v32 = vpop.xlane.xlu0 %312 }
 0x109   : > { %324 = vst.msk [vmem:[%s222_s30] sm:$0xff] %vm323_vm1, %v313_v32 }
 0x10a   : > { %v338_v33 = vpop.xlane.xlu2 %337 }
 0x10b   : > { %348 = vst.msk [vmem:[%s231_s6] sm:$0xff] %vm323_vm1, %v338_v33 }
 0x10e   : > { %v319_v34 = vpop.xlane.xlu1 %318 }
 0x10f   : > { %326 = vst.msk [vmem:[%s222_s30 + $0x10] sm:$0xff] %vm323_vm1, %v319_v34 }
 0x110   : > { %v316_v35 = vpop.xlane.xlu0 %315 }
 0x111   : > { %325 = vst.msk [vmem:[%s222_s30 + $0x8] sm:$0xff] %vm323_vm1, %v316_v35 }
 0x112   : > { %v341_v36 = vpop.xlane.xlu2 %340 }
 0x113   : > { %349 = vst.msk [vmem:[%s231_s6 + $0x8] sm:$0xff] %vm323_vm1, %v341_v36 }
 0x116   : > { %v322_v37 = vpop.xlane.xlu1 %321 }
 0x117   : > { %327 = vst.msk [vmem:[%s222_s30 + $0x18] sm:$0xff] %vm323_vm1, %v322_v37 }
 0x118   : > { %v344_v38 = vpop.xlane.xlu0 %343 }
 0x119   : > { %350 = vst.msk [vmem:[%s231_s6 + $0x10] sm:$0xff] %vm323_vm1, %v344_v38 }
 0x11e   : > { %v347_v39 = vpop.xlane.xlu1 %346 }
 0x11f   : > { %351 = vst.msk [vmem:[%s231_s6 + $0x18] sm:$0xff] %vm323_vm1, %v347_v39 }
 0x120 PF: > { %s14_s14 = sadd.s32 1, %s568_s14   ;;  %s655_s12 = smov %s564_s13 }
 0x121   : > { %p11_p5 = scmp.ge.s32.totalorder %s14_s14, 4   ;;  %s656_s13 = smov %s658_s15 }
 0x123   :  { %13 = sbr.rel (!%p11_p5) target bundleno = 2 (0x2), region = 70 }

// kernel: upsampler_b_forward.3
= control target key start
LH: loop header
LB: loop body
LE: loop exit
PB: predicated region body
PF: predicated region fallthrough
CT: control target
= control target key end

     0   :  { %s586_s15 = smov 0   ;;  %s588_s16 = smov 0   ;;  %s677_s0 = inlined_call_operand.vmem [shape: f32[2,16,256], index: 0, kind: input, shape index: {}]   ;;  %s678_s1 = inlined_call_operand.vmem [shape: f32[32,16], index: 1, kind: input, shape index: {}]   ;;  %s679_s2 = inlined_call_operand.vmem [shape: f32[32,1], index: 2, kind: input, shape index: {}]   ;;  %s680_s3 = inlined_call_operand.vmem [shape: f32[32,1], index: 3, kind: input, shape index: {}]   ;;  %s681_s4 = inlined_call_operand.vmem [shape: f32[2,32,256], index: 4, kind: output, shape index: {}]  }
   0x1   :  { %s590_s17 = smov 0  }
   0x2 LB: > { %s26_s18 = sadd.s32 1, %s554_s16  ;;  %p487_p0 = scmp.ge.s32.totalorder %s558_s17, 1  ;;  %s558_s17 = sphi %s590_s17, %s14_s17   ;;  %s554_s16 = sphi %s588_s16, %s683_s16   ;;  %s550_s15 = sphi %s586_s15, %s682_s15  }
   0x3   : > { %p28_p1 = scmp.ge.s32.totalorder %s26_s18, 2  ;;  %p183_p2 = scmp.lt.s32.totalorder %s558_s17, 3 }
   0x5   : > { %s685_s18 = smov (%p28_p1, %s26_s18), 0  ;;  %p184_p3 = pnand %p487_p0, %p183_p2 }
   0x6   : > { %p218_p4 = scmp.lt.s32.totalorder (!%p184_p3), %s550_s15, 1 }
   0x7   : > { %187 = sbr.rel (%p184_p3) target bundleno = 169 (0xa9), region = 36 }
   0xc   : > { %v318_v0 = vld [vmem:[%s679_s2 + $0x10] sm:$0xff]  ;;  %v316_v1 = vld [vmem:[%s679_s2] sm:$0xff]  ;;  %v560_v2 = vmov 0   ;;  %s687_s15 = smov (!%p218_p4, %s550_s15), 1  ;;  %vm245_vm0 = vcmask 130048   ;;  %v319_v10 = vld [vmem:[%s679_s2 + $0x18] sm:$0xff] }
   0xd   : > { %534 = vset.pattern.permute.xlu1 %v560_v2  ;;  %533 = vset.pattern.permute.xlu0 %v560_v2  ;;  %v348_v3 = vld [vmem:[%s680_s3] sm:$0xff]  ;;  %s502_s25 = sshll.u32 %s687_s15, 5  ;;  %v239_v9 = vld [vmem:[%s678_s1 + $0x10] sm:$0xff]  ;;  %v317_v11 = vld [vmem:[%s679_s2 + $0x8] sm:$0xff] }
   0xe   : > { %332 = vperm.xlu1 %534, %v318_v0   ;;  %322 = vperm.xlu0 %533, %v316_v1   ;;  %s225_s28 = scalar_lea.vmem %s677_s0, %s502_s25  ;;  %v237_v8 = vld [vmem:[%s678_s1] sm:$0xff]  ;;  %v349_v12 = vld [vmem:[%s680_s3 + $0x8] sm:$0xff]  ;;  %v240_v14 = vld [vmem:[%s678_s1 + $0x18] sm:$0xff]  ;;  %s503_s25 = sshll.u32 %s687_s15, 6 }
   0xf   : > { %535 = vset.pattern.permute.xlu2 %v560_v2  ;;  %v243_v4 = vld [vmem:[%s225_s28 + $0x10] sm:$0xff]  ;;  %v244_v5 = vld [vmem:[%s225_s28 + $0x18] sm:$0xff]  ;;  %v241_v6 = vld [vmem:[%s225_s28] sm:$0xff] }
  0x10   : > { %354 = vperm.xlu2 %535, %v348_v3   ;;  %272 = vmatpush.msra.mxu0 %v243_v4  ;;  %v242_v7 = vld [vmem:[%s225_s28 + $0x8] sm:$0xff]  ;;  %v351_v15 = vld [vmem:[%s680_s3 + $0x18] sm:$0xff]  ;;  %v350_v16 = vld [vmem:[%s680_s3 + $0x10] sm:$0xff]  ;;  %s658_s28 = scalar_lea.vmem %s681_s4, %s503_s25 }
  0x11   : > { %504 = vmatpush.msra.mxu2 %v243_v4  ;;  %301 = vmatpush.msra.mxu1 %v244_v5  ;;  %v238_v13 = vld [vmem:[%s678_s1 + $0x8] sm:$0xff] }
  0x12   : > { %506 = vmatpush.msra.mxu3 %v244_v5  ;;  %273 = vmatpush.msra.mxu0 %v241_v6 }
  0x13   : > { %505 = vmatpush.msra.mxu2 %v241_v6  ;;  %302 = vmatpush.msra.mxu1 %v242_v7 }
  0x14   : > { %507 = vmatpush.msra.mxu3 %v242_v7  ;;  %492 = vmatmul.msk.f32.vlgmr.msra.gmra.mxu0 %vm245_vm0, %v237_v8 }
  0x15   : > { %494 = vmatmul.msk.f32.vlgmr.msra.gmra.mxu2 %vm245_vm0, %v239_v9  ;;  %496 = vmatmul.msk.f32.vlgmr.msra.gmra.mxu1 %vm245_vm0, %v237_v8 }
  0x16   : > { %498 = vmatmul.msk.f32.vlgmr.msra.gmra.mxu3 %vm245_vm0, %v239_v9  ;;  %337 = vperm.xlu1 %534, %v319_v10  }
  0x17   : > { %327 = vperm.xlu0 %533, %v317_v11  }
  0x18   : > { %359 = vperm.xlu2 %535, %v349_v12  }
  0x1c   : > { %493 = vmatmul.msk.f32.gmra.mxu0 %vm245_vm0, %v238_v13 }
  0x1d   : > { %495 = vmatmul.msk.f32.gmra.mxu2 %vm245_vm0, %v240_v14  ;;  %497 = vmatmul.msk.f32.gmra.mxu1 %vm245_vm0, %v238_v13 }
  0x1e   : > { %499 = vmatmul.msk.f32.gmra.mxu3 %vm245_vm0, %v240_v14  ;;  %369 = vperm.xlu1 %534, %v351_v15  }
  0x1f   : > { %364 = vperm.xlu0 %533, %v350_v16  }
  0x6a   : > { %v355_v20 = vpop.permute.xlu2 %354 }
  0x72   : > { %v360_v40 = vpop.permute.xlu2 %359 }
  0x80   : > { %v323_v17 = vpop.permute.xlu0 %322  ;;  %v333_v18 = vpop.permute.xlu1 %332 }
  0x88   : > { %v338_v28 = vpop.permute.xlu1 %337 }
  0x89   : > { %v328_v19 = vpop.permute.xlu0 %327 }
  0x90   : > { %v370_v51 = vpop.permute.xlu1 %369 }
  0x91   : > { %v275_v21 = vpop.f32.mrf.mxu0  ;;  %v365_v33 = vpop.permute.xlu0 %364 }
  0x92   : > { %v340_v22 = vmul.f32 %v323_v17, %v275_v21  ;;  %v304_v23 = vpop.f32.mrf.mxu1 }
  0x93   : > { %v341_v24 = vmul.f32 %v323_v17, %v304_v23 }
  0x94   : > { %v372_v25 = vadd.f32 %v355_v20, %v340_v22 }
  0x95   : > { %v373_v26 = vadd.f32 %v355_v20, %v341_v24 }
  0x96   : > { %v380_v27 = vmax.f32 %v372_v25, 0.0 }
  0x97   : > { %v381_v29 = vmax.f32 %v373_v26, 0.0 }
  0x98   : > { %v281_v30 = vpop.f32.mrf.mxu2  ;;  %388 = vst [vmem:[%s658_s28] sm:$0xff] %v380_v27 }
  0x99   : > { %v344_v31 = vmul.f32 %v333_v18, %v281_v30  ;;  %v310_v32 = vpop.f32.mrf.mxu3  ;;  %389 = vst [vmem:[%s658_s28 + $0x8] sm:$0xff] %v381_v29  ;;  %v278_v35 = vpop.f32.mrf.mxu0 }
  0x9a   : > { %v345_v34 = vmul.f32 %v333_v18, %v310_v32  ;;  %v342_v37 = vmul.f32 %v328_v19, %v278_v35  ;;  %v307_v38 = vpop.f32.mrf.mxu1 }
  0x9b   : > { %v376_v36 = vadd.f32 %v365_v33, %v344_v31  ;;  %v343_v41 = vmul.f32 %v328_v19, %v307_v38 }
  0x9c   : > { %v377_v39 = vadd.f32 %v365_v33, %v345_v34  ;;  %v374_v43 = vadd.f32 %v360_v40, %v342_v37 }
  0x9d   : > { %v384_v42 = vmax.f32 %v376_v36, 0.0  ;;  %v375_v45 = vadd.f32 %v360_v40, %v343_v41 }
  0x9e   : > { %v385_v44 = vmax.f32 %v377_v39, 0.0  ;;  %v382_v46 = vmax.f32 %v374_v43, 0.0 }
  0x9f   : > { %392 = vst [vmem:[%s658_s28 + $0x20] sm:$0xff] %v384_v42  ;;  %v383_v47 = vmax.f32 %v375_v45, 0.0 }
  0xa0   : > { %393 = vst [vmem:[%s658_s28 + $0x28] sm:$0xff] %v385_v44  ;;  %v284_v48 = vpop.f32.mrf.mxu2 }
  0xa1   : > { %390 = vst [vmem:[%s658_s28 + $0x10] sm:$0xff] %v382_v46  ;;  %v346_v49 = vmul.f32 %v338_v28, %v284_v48  ;;  %v313_v50 = vpop.f32.mrf.mxu3 }
  0xa2   : > { %391 = vst [vmem:[%s658_s28 + $0x18] sm:$0xff] %v383_v47  ;;  %v347_v52 = vmul.f32 %v338_v28, %v313_v50 }
  0xa3   : > { %v378_v53 = vadd.f32 %v370_v51, %v346_v49 }
  0xa4   : > { %v379_v54 = vadd.f32 %v370_v51, %v347_v52 }
  0xa5   : > { %v386_v55 = vmax.f32 %v378_v53, 0.0 }
  0xa6   : > { %v387_v56 = vmax.f32 %v379_v54, 0.0 }
  0xa7   : > { %394 = vst [vmem:[%s658_s28 + $0x30] sm:$0xff] %v386_v55 }
  0xa8   : > { %395 = vst [vmem:[%s658_s28 + $0x38] sm:$0xff] %v387_v56 }
  0xa9 PF: > { %s14_s17 = sadd.s32 1, %s558_s17   ;;  %s682_s15 = smov %s554_s16 }
  0xaa   : > { %p11_p5 = scmp.ge.s32.totalorder %s14_s17, 4   ;;  %s683_s16 = smov %s685_s18 }
  0xac   :  { %13 = sbr.rel (!%p11_p5) target bundleno = 2 (0x2), region = 66 }

</bundles_post_ra>
